<compile_context>
chip_gen: v6e
topology: v6e:2x2x1
jax: 0.10.0
libtpu: 0.0.40
codegen_flags: <defaults>
</compile_context>

<pallas_src>
import jax
import jax.numpy as jnp
from jax.experimental import pallas as pl
from jax.experimental.pallas import tpu as pltpu


def _round_up(n, m):
    return ((n + m - 1) // m) * m


def mlp_kernel(x_ref, w1_ref, b1_ref, w2_ref, b2_ref, o_ref):
    # Hidden layer on the MXU (f32 accumulate); bias add + ReLU on the VPU.
    h = jnp.dot(x_ref[...], w1_ref[...], preferred_element_type=jnp.float32)
    h = jnp.maximum(h + b1_ref[...], 0.0)                        # (TB, H) f32
    # Output layer (width 1): elementwise multiply + lane reduce (XLU) instead of pushing
    # an (H, 1) RHS through the MXU where only one result column would be useful.
    z = jnp.sum(h * w2_ref[...], axis=-1)                        # (TB,)
    # Relayout the raw sums to the lane-dense (1, TB) row first, then do the bias add and
    # the sigmoid in that layout so the store stays an unmasked lane-dense vst.
    z_row = z.reshape(1, -1) + b2_ref[0]                         # (1, TB)
    # Sigmoid via tanh: a single EUP push per element, exact.
    s = 0.5 * jnp.tanh(0.5 * z_row) + 0.5
    o_ref[...] = s.astype(o_ref.dtype)


def neural_net_forward(x, w1, b1, w2, b2, *, block_batch=4096):
    B, in_size = x.shape
    hidden = w1.shape[1]

    b1_row = jnp.asarray(b1, jnp.float32).reshape(1, hidden)
    w2_row = jnp.asarray(w2, jnp.float32).reshape(1, hidden)   # (H, 1) column used as a row
    b2_s = jnp.asarray(b2, jnp.float32).reshape(1)             # scalar for SMEM

    # Batch tile: multiple of 128 (lane-dense (1, tb) output block), capped by the batch.
    tb = min(_round_up(block_batch, 128), _round_up(B, 128))
    # v7x megacore: prefer >= 2 grid steps when the batch allows it so the "parallel"
    # batch axis can shard across both TensorCores (no-op on single-TC v5e/v6e).
    if B > 128 and pl.cdiv(B, tb) < 2:
        tb = _round_up(pl.cdiv(B, 2), 128)
    grid = (pl.cdiv(B, tb),)   # ragged last block handled by Pallas masking; no jnp.pad copy

    # Explicit VMEM budget (lane-padded, double-buffered) so the kernel stays portable to
    # v7x's 64 MiB/TC VMEM as shapes grow; clamp to [32 MiB, 48 MiB].
    x_bytes = jnp.dtype(x.dtype).itemsize
    w1_bytes = jnp.dtype(w1.dtype).itemsize
    budget = (
        2 * tb * _round_up(in_size, 128) * x_bytes              # x tile, double-buffered
        + 2 * _round_up(in_size, 8) * _round_up(hidden, 128) * w1_bytes  # resident w1
        + 4 * _round_up(hidden, 128) * 4                         # b1 + w2 rows
        + 2 * tb * _round_up(hidden, 128) * 4                    # (TB, H) f32 intermediates
        + 2 * 8 * tb * 4                                         # (1, tb) output blocks
    )
    vmem_limit = min(max(2 * budget, 32 * 1024 * 1024), 48 * 1024 * 1024)

    out_row = pl.pallas_call(
        mlp_kernel,
        out_shape=jax.ShapeDtypeStruct((1, B), jnp.float32),
        grid=grid,
        in_specs=[
            pl.BlockSpec((tb, in_size), lambda i: (i, 0)),      # x: streamed per batch tile
            pl.BlockSpec((in_size, hidden), lambda i: (0, 0)),  # w1: resident
            pl.BlockSpec((1, hidden), lambda i: (0, 0)),        # b1: resident
            pl.BlockSpec((1, hidden), lambda i: (0, 0)),        # w2 row: resident
            pl.BlockSpec(memory_space=pltpu.SMEM),              # b2: scalar in SMEM
        ],
        out_specs=pl.BlockSpec((1, tb), lambda i: (0, i)),      # lane-dense output slab
        compiler_params=pltpu.CompilerParams(
            dimension_semantics=("parallel",),                  # megacore sharding on v7x
            vmem_limit_bytes=vmem_limit,
        ),
    )(x, w1, b1_row, w2_row, b2_s)

    return out_row[0].reshape(B, 1)


if __name__ == "__main__":
    batch, input_size, hidden_size = 8, 16, 32

    key = jax.random.PRNGKey(0)
    kx, kw1, kb1, kw2, kb2, kx2 = jax.random.split(key, 6)

    # Deterministic PyTorch-style uniform init: U(-1/sqrt(fan_in), 1/sqrt(fan_in)).
    bound1 = 1.0 / (input_size ** 0.5)
    bound2 = 1.0 / (hidden_size ** 0.5)
    w1 = jax.random.uniform(kw1, (input_size, hidden_size), jnp.float32, -bound1, bound1)
    b1 = jax.random.uniform(kb1, (hidden_size,), jnp.float32, -bound1, bound1)
    w2 = jax.random.uniform(kw2, (hidden_size, 1), jnp.float32, -bound2, bound2)
    b2 = jax.random.uniform(kb2, (1,), jnp.float32, -bound2, bound2)

    def reference(xv):
        return jax.nn.sigmoid(jnp.maximum(xv @ w1 + b1[None, :], 0.0) @ w2 + b2[None, :])

    # Small batch (single ragged tile, no padding copy).
    x = jax.random.normal(kx, (batch, input_size), dtype=jnp.float32)
    out = neural_net_forward(x, w1, b1, w2, b2)
    jax.block_until_ready(out)
    assert out.shape == (batch, 1)
    assert jnp.allclose(out, reference(x), atol=1e-5, rtol=1e-5)

    # Larger, non-multiple batch: exercises multi-tile grid (>=2 steps) + ragged last block.
    x2 = jax.random.normal(kx2, (1000, input_size), dtype=jnp.float32)
    out2 = neural_net_forward(x2, w1, b1, w2, b2)
    jax.block_until_ready(out2)
    assert out2.shape == (1000, 1)
    assert jnp.allclose(out2, reference(x2), atol=1e-5, rtol=1e-5)

    # bf16 activation/weight path (demo cast only; in production the producer emits bf16).
    out3 = neural_net_forward(
        x2.astype(jnp.bfloat16), w1.astype(jnp.bfloat16), b1, w2, b2
    )
    jax.block_until_ready(out3)
    assert out3.shape == (1000, 1)
    assert jnp.allclose(out3, reference(x2), atol=5e-2, rtol=5e-2)

    print("KERNEL_OK")
</pallas_src>

<mosaic_0001>
module attributes {stable_mosaic.version = 11 : i64} {
  func.func @mlp_kernel(%arg0: i32, %arg1: memref<128x16xf32, #tpu.memory_space<vmem>>, %arg2: memref<16x32xf32, #tpu.memory_space<vmem>>, %arg3: memref<1x32xf32, #tpu.memory_space<vmem>>, %arg4: memref<1x32xf32, #tpu.memory_space<vmem>>, %arg5: memref<1xf32, #tpu.memory_space<smem>>, %arg6: memref<1x128xf32, #tpu.memory_space<vmem>>) attributes {dimension_semantics = [#tpu.dimension_semantics<parallel>], iteration_bounds = array<i64: 1>, scalar_prefetch = 0 : i64, scratch_operands = 0 : i64, tpu.core_type = #tpu.core_type<tc>, window_params = [{transform_indices = @transform_0, window_bounds = array<i64: 128, 16>}, {pipeline_mode = #tpu.pipeline_mode<synchronous>, transform_indices = @transform_1, window_bounds = array<i64: 16, 32>}, {pipeline_mode = #tpu.pipeline_mode<synchronous>, transform_indices = @transform_2, window_bounds = array<i64: 1, 32>}, {pipeline_mode = #tpu.pipeline_mode<synchronous>, transform_indices = @transform_3, window_bounds = array<i64: 1, 32>}, {transform_indices = @transform_4, window_bounds = array<i64: 1>}, {transform_indices = @transform_5, window_bounds = array<i64: 1, 128>}]} {
    %c0 = arith.constant 0 : index
    %c0_0 = arith.constant 0 : index
    %0 = vector.load %arg1[%c0, %c0_0] : memref<128x16xf32, #tpu.memory_space<vmem>>, vector<128x16xf32>
    %c0_1 = arith.constant 0 : index
    %c0_2 = arith.constant 0 : index
    %1 = vector.load %arg2[%c0_1, %c0_2] : memref<16x32xf32, #tpu.memory_space<vmem>>, vector<16x32xf32>
    %cst = arith.constant dense<0.000000e+00> : vector<128x32xf32>
    %2 = tpu.matmul %0, %1, %cst {dimension_numbers = #tpu.dot_dimension_numbers<[1], [0], [0], [1], [0, 0, 1, 1], [], []>} : vector<128x16xf32>, vector<16x32xf32>, vector<128x32xf32> -> vector<128x32xf32>
    %c0_3 = arith.constant 0 : index
    %c0_4 = arith.constant 0 : index
    %3 = vector.load %arg3[%c0_3, %c0_4] : memref<1x32xf32, #tpu.memory_space<vmem>>, vector<1x32xf32>
    %4 = vector.broadcast %3 : vector<1x32xf32> to vector<128x32xf32>
    %5 = arith.addf %2, %4 : vector<128x32xf32>
    %cst_5 = arith.constant 0.000000e+00 : f32
    %6 = vector.broadcast %cst_5 : f32 to vector<128x32xf32>
    %7 = arith.maximumf %5, %6 : vector<128x32xf32>
    %c0_6 = arith.constant 0 : index
    %c0_7 = arith.constant 0 : index
    %8 = vector.load %arg4[%c0_6, %c0_7] : memref<1x32xf32, #tpu.memory_space<vmem>>, vector<1x32xf32>
    %9 = vector.broadcast %8 : vector<1x32xf32> to vector<128x32xf32>
    %10 = arith.mulf %7, %9 : vector<128x32xf32>
    %cst_8 = arith.constant dense<0.000000e+00> : vector<128xf32>
    %11 = vector.multi_reduction <add>, %10, %cst_8 [1] : vector<128x32xf32> to vector<128xf32>
    %12 = vector.shape_cast %11 : vector<128xf32> to vector<1x128xf32>
    %c0_9 = arith.constant 0 : index
    %13 = memref.load %arg5[%c0_9] : memref<1xf32, #tpu.memory_space<smem>>
    %14 = vector.broadcast %13 : f32 to vector<1x128xf32>
    %15 = arith.addf %12, %14 : vector<1x128xf32>
    %cst_10 = arith.constant 5.000000e-01 : f32
    %16 = vector.broadcast %cst_10 : f32 to vector<1x128xf32>
    %17 = arith.mulf %16, %15 : vector<1x128xf32>
    %18 = math.tanh %17 : vector<1x128xf32>
    %cst_11 = arith.constant 5.000000e-01 : f32
    %19 = vector.broadcast %cst_11 : f32 to vector<1x128xf32>
    %20 = arith.mulf %19, %18 : vector<1x128xf32>
    %cst_12 = arith.constant 5.000000e-01 : f32
    %21 = vector.broadcast %cst_12 : f32 to vector<1x128xf32>
    %22 = arith.addf %20, %21 : vector<1x128xf32>
    %c0_13 = arith.constant 0 : index
    %c0_14 = arith.constant 0 : index
    %23 = vector.load %arg6[%c0_13, %c0_14] : memref<1x128xf32, #tpu.memory_space<vmem>>, vector<1x128xf32>
    tpu.vector_store %arg6[%c0_13, %c0_14], %22 {strides = array<i32>} : memref<1x128xf32, #tpu.memory_space<vmem>>, vector<1x128xf32>,
    return
  }
  func.func @transform_0(%arg0: i32) -> (i32, i32) {
    %c0_i32 = arith.constant 0 : i32
    %c0_i32_0 = arith.constant 0 : i32
    return %arg0, %c0_i32 : i32, i32
  }
  func.func @transform_1(%arg0: i32) -> (i32, i32) {
    %c0_i32 = arith.constant 0 : i32
    %c0_i32_0 = arith.constant 0 : i32
    %c0_i32_1 = arith.constant 0 : i32
    return %c0_i32, %c0_i32_0 : i32, i32
  }
  func.func @transform_2(%arg0: i32) -> (i32, i32) {
    %c0_i32 = arith.constant 0 : i32
    %c0_i32_0 = arith.constant 0 : i32
    %c0_i32_1 = arith.constant 0 : i32
    return %c0_i32, %c0_i32_0 : i32, i32
  }
  func.func @transform_3(%arg0: i32) -> (i32, i32) {
    %c0_i32 = arith.constant 0 : i32
    %c0_i32_0 = arith.constant 0 : i32
    %c0_i32_1 = arith.constant 0 : i32
    return %c0_i32, %c0_i32_0 : i32, i32
  }
  func.func @transform_4(%arg0: i32) -> i32 {
    %c0_i32 = arith.constant 0 : i32
    %c0_i32_0 = arith.constant 0 : i32
    return %c0_i32 : i32
  }
  func.func @transform_5(%arg0: i32) -> (i32, i32) {
    %c0_i32 = arith.constant 0 : i32
    %c0_i32_0 = arith.constant 0 : i32
    return %c0_i32, %arg0 : i32, i32
  }
}

</mosaic_0001>

<bundles_post_ra>
// kernel: tpu_custom_call.1
= control target key start
LH: loop header
LB: loop body
LE: loop exit
PB: predicated region body
PF: predicated region fallthrough
CT: control target
= control target key end

     0   :  { %11 = vsyncpa [#allocation4], 0  ;;  %s979_s0 = inlined_call_operand.hbm [shape: f32[8,16], index: 0, kind: input, shape index: {}]   ;;  %s980_s1 = inlined_call_operand.hbm [shape: f32[16,32], index: 1, kind: input, shape index: {}]   ;;  %s981_s2 = inlined_call_operand.vmem [shape: f32[1,32], index: 2, kind: input, shape index: {}]   ;;  %s982_s3 = inlined_call_operand.vmem [shape: f32[1,32], index: 3, kind: input, shape index: {}]   ;;  %s983_s4 = inlined_call_operand.<no memory space> [shape: f32[1], index: 4, kind: input, shape index: {}]   ;;  %s984_s5 = inlined_call_operand.hbm [shape: f32[1,8], index: 5, kind: output, shape index: {}]  }
   0x1   :  { %12 = vsyncpa [#allocation7], 0 }
   0x2   :  { %13 = vsyncpa [#allocation5], 0 }
   0x3   :  { %18 = vsyncadd [#allocation4], 1920  ;;  %s755_s18 = smov [#allocation3]  }
   0x4   :  { %s19_s19 = sshll.u32 %s755_s18, 4  ;;  %s20_s19 = int_to_ptr.vmem [resolvable:$true] %s19_s19 }
   0x5   :  { %s697_s20 = scalar_lea.vmem %s20_s19, 128  ;;  %s701_s21 = scalar_lea.vmem %s20_s19, 2048 }
   0x6   :  { %p698_p0 = scmp.ne.s32.totalorder %s20_s19, %s697_s20  ;;  %p702_p1 = scmp.lt.s32.totalorder %s20_s19, %s20_s19 }
   0x7   :  { %p703_p2 = scmp.lt.s32.totalorder %s701_s21, %s697_s20 }
   0x9   :  { %p704_p3 = por %p703_p2, %p702_p1 }
   0xb   :  { %p705_p4 = pnand %p704_p3, %p698_p0 }
   0xd   :  { %708 = shalt.err (!%p705_p4)
}
   0xe   :  { %s756_s22 = smov 128   ;;  %s757_s23 = smov 8  }
   0xf   :  { %25 = dma.hbm_to_vmem [thread:$0]  %s979_s0, 128, %s20_s19, [#allocation4], %s756_s22, %s756_s22, %s757_s23  }
  0x10   :  { %s758_s26 = smov [#allocation6]  }
  0x11   :  { %s31_s27 = sshll.u32 %s758_s26, 4  ;;  %s32_s27 = int_to_ptr.vmem [resolvable:$true] %s31_s27 }
  0x12   :  { %s717_s28 = scalar_lea.vmem %s32_s27, 256  ;;  %p722_p6 = scmp.lt.s32.totalorder %s32_s27, %s32_s27 }
  0x13   :  { %p718_p5 = scmp.ne.s32.totalorder %s32_s27, %s717_s28  ;;  %p723_p7 = scmp.lt.s32.totalorder %s717_s28, %s717_s28 }
  0x15   :  { %p724_p8 = por %p723_p7, %p722_p6 }
  0x17   :  { %p725_p9 = pnand %p724_p8, %p718_p5 }
  0x19   :  { %728 = shalt.err (!%p725_p9)
}
  0x1a   :  { %37 = dma.hbm_to_vmem [thread:$0]  %s980_s1, 256, %s32_s27, [#allocation7], %s756_s22, %s756_s22, %s757_s23  }
  0x1b   :  { %749 = dma.done.wait [#allocation4], 2048  }
  0x1c   :  { %750 = vsyncadd [#allocation4], 4294965248 }
  0x1d   :  { %751 = dma.done.wait [#allocation7], 256  }
  0x1e   :  { %752 = vsyncadd [#allocation7], 4294967040  ;;  %v67_v0 = vld [vmem:[#allocation6 + $0x8] sm:$0xff]  ;;  %v66_v1 = vld [vmem:[#allocation6] sm:$0xff]  ;;  %vm75_vm0 = vcmask 130048   ;;  %vm308_vm1 = vcmask 261120  }
  0x1f   :  { %620 = vmatprep.subr.mxu0 %v67_v0  ;;  %648 = vmatprep.subr.mxu1 %v67_v0  ;;  %v50_v2 = vld [vmem:[#allocation3] sm:$0xff]  ;;  %v51_v4 = vld [vmem:[#allocation3 + $0x8] sm:$0xff]  ;;  %v52_v6 = vld [vmem:[#allocation3 + $0x10] sm:$0xff]  ;;  %vm466_vm2 = vcmask 130112   ;;  %vm473_vm3 = vcmask 195712   ;;  %vm480_vm4 = vcmask 261312  }
  0x20   :  { %621 = vmatpush3.msra.mxu0 %v67_v0  ;;  %650 = vmatpush3.msra.mxu1 %v67_v0  ;;  %v58_v3 = vld [vmem:[#allocation3 + $0x40] sm:$0xff]  ;;  %v59_v5 = vld [vmem:[#allocation3 + $0x48] sm:$0xff]  ;;  %v60_v7 = vld [vmem:[#allocation3 + $0x50] sm:$0xff]  ;;  %vm487_vm5 = vcmask 326912   ;;  %vm494_vm6 = vcmask 392512   ;;  %vm501_vm7 = vcmask 458112  }
  0x21   :  { %622 = vmatprep.subr.mxu0 %v66_v1  ;;  %649 = vmatprep.subr.mxu1 %v66_v1  ;;  %v53_v8 = vld [vmem:[#allocation3 + $0x18] sm:$0xff]  ;;  %v54_v10 = vld [vmem:[#allocation3 + $0x20] sm:$0xff]  ;;  %v55_v12 = vld [vmem:[#allocation3 + $0x28] sm:$0xff]  ;;  %vm508_vm8 = vcmask 523712   ;;  %vm515_vm9 = vcmask 589312   ;;  %vm522_vm10 = vcmask 654912  }
  0x22   :  { %623 = vmatpush3.msra.mxu0 %v66_v1  ;;  %651 = vmatpush3.msra.mxu1 %v66_v1  ;;  %v61_v9 = vld [vmem:[#allocation3 + $0x58] sm:$0xff]  ;;  %v62_v11 = vld [vmem:[#allocation3 + $0x60] sm:$0xff]  ;;  %v63_v13 = vld [vmem:[#allocation3 + $0x68] sm:$0xff]  ;;  %vm529_vm11 = vcmask 720512   ;;  %vm536_vm12 = vcmask 786112   ;;  %vm543_vm13 = vcmask 851712  }
  0x23   :  { %624 = vmatprep.mubr.msk.f32.mxu0 %vm75_vm0, %v50_v2  ;;  %636 = vmatprep.mubr.msk.f32.mxu1 %vm75_vm0, %v58_v3  ;;  %v56_v14 = vld [vmem:[#allocation3 + $0x30] sm:$0xff]  ;;  %v57_v16 = vld [vmem:[#allocation3 + $0x38] sm:$0xff]  ;;  %v815_v18 = vld [vmem:[%s981_s2] ss:$0 sm:$0xff]  ;;  %vm550_vm14 = vcmask 917312   ;;  %vm557_vm15 = vcmask 982912  }
  0x24   :  { %625 = vmatmul.mubr.msk.f32.vlgmr.msra.gmra.mxu0 %vm75_vm0, %v51_v4  ;;  %637 = vmatmul.mubr.msk.f32.vlgmr.msra.gmra.mxu1 %vm75_vm0, %v59_v5  ;;  %v64_v15 = vld [vmem:[#allocation3 + $0x70] sm:$0xff]  ;;  %v65_v17 = vld [vmem:[#allocation3 + $0x78] sm:$0xff]  ;;  %v824_v29 = vld [vmem:[%s982_s3] ss:$0 sm:$0xff] }
  0x25   :  { %627 = vmatprep.mubr.msk.f32.mxu0 %vm75_vm0, %v52_v6  ;;  %639 = vmatprep.mubr.msk.f32.mxu1 %vm75_vm0, %v60_v7 }
  0x28   :  { %628 = vmatmul.mubr.msk.f32.gmra.mxu0 %vm75_vm0, %v53_v8  ;;  %640 = vmatmul.mubr.msk.f32.gmra.mxu1 %vm75_vm0, %v61_v9 }
  0x29   :  { %630 = vmatprep.mubr.msk.f32.mxu0 %vm75_vm0, %v54_v10  ;;  %642 = vmatprep.mubr.msk.f32.mxu1 %vm75_vm0, %v62_v11 }
  0x2c   :  { %631 = vmatmul.mubr.msk.f32.gmra.mxu0 %vm75_vm0, %v55_v12  ;;  %643 = vmatmul.mubr.msk.f32.gmra.mxu1 %vm75_vm0, %v63_v13 }
  0x2d   :  { %633 = vmatprep.mubr.msk.f32.mxu0 %vm75_vm0, %v56_v14  ;;  %645 = vmatprep.mubr.msk.f32.mxu1 %vm75_vm0, %v64_v15 }
  0x30   :  { %634 = vmatmul.mubr.msk.f32.gmra.mxu0 %vm75_vm0, %v57_v16  ;;  %646 = vmatmul.mubr.msk.f32.gmra.mxu1 %vm75_vm0, %v65_v17  ;;  %vm564_vm0 = vcmask 1048512  }
  0xe4   :  { %v626_v19 = vpop.f32.mrf.mxu0  ;;  %v638_v20 = vpop.f32.mrf.mxu1 }
  0xe5   :  { %v196_v21 = vadd.f32 %v626_v19, %v815_v18  ;;  %v236_v22 = vadd.f32 %v638_v20, %v815_v18 }
  0xe6   :  { %v190_v23 = vpop.f32.mrf.mxu0  ;;  %v230_v24 = vpop.f32.mrf.mxu1 }
  0xe7   :  { %v270_v25 = vmax.f32 %v196_v21, 0.0  ;;  %v278_v26 = vmax.f32 %v236_v22, 0.0  ;;  %v191_v27 = vadd.f32 %v815_v18, %v190_v23  ;;  %v231_v28 = vadd.f32 %v815_v18, %v230_v24 }
  0xe8   :  { %v629_v30 = vpop.f32.mrf.mxu0  ;;  %v641_v31 = vpop.f32.mrf.mxu1 }
  0xe9   :  { %v269_v32 = vmax.f32 %v191_v27, 0.0  ;;  %v206_v33 = vadd.f32 %v629_v30, %v815_v18  ;;  %v246_v34 = vadd.f32 %v641_v31, %v815_v18  ;;  %v301_v36 = vmul.f32 %v824_v29, %v278_v26 }
  0xea   :  { %v200_v35 = vpop.f32.mrf.mxu0  ;;  %v293_v37 = vmul.f32 %v824_v29, %v270_v25  ;;  %v240_v38 = vpop.f32.mrf.mxu1  ;;  %v277_v39 = vmax.f32 %v231_v28, 0.0 }
  0xeb   :  { %v272_v40 = vmax.f32 %v206_v33, 0.0  ;;  %v201_v41 = vadd.f32 %v815_v18, %v200_v35  ;;  %v280_v42 = vmax.f32 %v246_v34, 0.0  ;;  %v336_v43 = vsel %vm308_vm1, %v301_v36, 0.0 }
  0xec   :  { %v312_v44 = vsel %vm308_vm1, %v293_v37, 0.0  ;;  %v241_v45 = vadd.f32 %v815_v18, %v240_v38  ;;  %v632_v46 = vpop.f32.mrf.mxu0  ;;  %v292_v47 = vmul.f32 %v824_v29, %v269_v32  ;;  %337 = vadd.xlane.f32.xlu1 %v336_v43  ;;  %v644_v49 = vpop.f32.mrf.mxu1  ;;  %v300_v55 = vmul.f32 %v824_v29, %v277_v39 }
  0xed   :  { %313 = vadd.xlane.f32.xlu0 %v312_v44  ;;  %v295_v48 = vmul.f32 %v824_v29, %v272_v40  ;;  %v303_v51 = vmul.f32 %v824_v29, %v280_v42  ;;  %v271_v52 = vmax.f32 %v201_v41, 0.0  ;;  %v216_v54 = vadd.f32 %v632_v46, %v815_v18 }
  0xee   :  { %v210_v50 = vpop.f32.mrf.mxu0  ;;  %v279_v56 = vmax.f32 %v241_v45, 0.0  ;;  %v309_v57 = vsel %vm308_vm1, %v292_v47, 0.0  ;;  %v250_v60 = vpop.f32.mrf.mxu1  ;;  %v333_v0 = vsel %vm308_vm1, %v300_v55, 0.0  ;;  %v256_v7 = vadd.f32 %v644_v49, %v815_v18 }
  0xef   :  { %v318_v53 = vsel %vm308_vm1, %v295_v48, 0.0  ;;  %v211_v58 = vadd.f32 %v815_v18, %v210_v50  ;;  %v342_v61 = vsel %vm308_vm1, %v303_v51, 0.0  ;;  %v274_v63 = vmax.f32 %v216_v54, 0.0 }
  0xf0   :  { %v635_v59 = vpop.f32.mrf.mxu0  ;;  %319 = vadd.xlane.f32.xlu1 %v318_v53  ;;  %v294_v1 = vmul.f32 %v824_v29, %v271_v52  ;;  %v302_v5 = vmul.f32 %v824_v29, %v279_v56  ;;  %v647_v6 = vpop.f32.mrf.mxu1  ;;  %v251_v9 = vadd.f32 %v815_v18, %v250_v60  ;;  %v282_v16 = vmax.f32 %v256_v7, 0.0 }
  0xf1   :  { %310 = vadd.xlane.f32.xlu0 %v309_v57  ;;  %v273_v2 = vmax.f32 %v211_v58, 0.0  ;;  %v226_v3 = vadd.f32 %v635_v59, %v815_v18  ;;  %v297_v10 = vmul.f32 %v824_v29, %v274_v63  ;;  %v266_v19 = vadd.f32 %v647_v6, %v815_v18 }
  0xf2   :  { %v220_v62 = vpop.f32.mrf.mxu0  ;;  %v315_v8 = vsel %vm308_vm1, %v294_v1, 0.0  ;;  %v339_v13 = vsel %vm308_vm1, %v302_v5, 0.0  ;;  %v260_v15 = vpop.f32.mrf.mxu1  ;;  %v281_v17 = vmax.f32 %v251_v9, 0.0  ;;  %v305_v26 = vmul.f32 %v824_v29, %v282_v16 }
  0xf3   :  { %v221_v4 = vadd.f32 %v815_v18, %v220_v62  ;;  %v276_v11 = vmax.f32 %v226_v3, 0.0  ;;  %v296_v14 = vmul.f32 %v824_v29, %v273_v2  ;;  %v324_v20 = vsel %vm308_vm1, %v297_v10, 0.0 }
  0xf4   :  { %343 = vadd.xlane.f32.xlu1 %v342_v61  ;;  %v261_v22 = vadd.f32 %v815_v18, %v260_v15  ;;  %v284_v25 = vmax.f32 %v266_v19, 0.0  ;;  %v304_v31 = vmul.f32 %v824_v29, %v281_v17  ;;  %v348_v18 = vsel %vm308_vm1, %v305_v26, 0.0 }
  0xf5   :  { %334 = vadd.xlane.f32.xlu0 %v333_v0  ;;  %v275_v12 = vmax.f32 %v221_v4, 0.0  ;;  %v321_v21 = vsel %vm308_vm1, %v296_v14, 0.0  ;;  %v299_v23 = vmul.f32 %v824_v29, %v276_v11  ;;  %v873_v37 = vstv %s983_s4  ;;  %s759_s4 = smov [#allocation8]  }
  0xf6   :  { %v283_v27 = vmax.f32 %v261_v22, 0.0  ;;  %v345_v32 = vsel %vm308_vm1, %v304_v31, 0.0  ;;  %v307_v33 = vmul.f32 %v824_v29, %v284_v25  ;;  %v455_v48 = vlaneseq  ;;  %s574_s8 = sshll.u32 %s759_s4, 4  ;;  %s575_s8 = int_to_ptr.vmem [resolvable:$true] %s574_s8 }
  0xf7   :  { %v298_v24 = vmul.f32 %v824_v29, %v275_v12  ;;  %v330_v28 = vsel %vm308_vm1, %v299_v23, 0.0  ;;  %s729_s9 = scalar_lea.vmem %s575_s8, 16  ;;  %s733_s10 = scalar_lea.vmem %s575_s8, 32 }
  0xf8   :  { %316 = vadd.xlane.f32.xlu1 %v315_v8  ;;  %v306_v34 = vmul.f32 %v824_v29, %v283_v27  ;;  %v354_v35 = vsel %vm308_vm1, %v307_v33, 0.0  ;;  %v881_v55 = vand.u32 127, %v455_v48  ;;  %v887_v1 = vshrl.u32 %v455_v48, 7  ;;  %p730_p10 = scmp.ne.s32.totalorder %s575_s8, %s729_s9  ;;  %p734_p11 = scmp.lt.s32.totalorder %s575_s8, %s575_s8 }
  0xf9   :  { %340 = vadd.xlane.f32.xlu0 %v339_v13  ;;  %v327_v30 = vsel %vm308_vm1, %v298_v24, 0.0  ;;  %p735_p12 = scmp.lt.s32.totalorder %s733_s10, %s729_s9 }
  0xfa   :  { %v351_v36 = vsel %vm308_vm1, %v306_v34, 0.0  ;;  %v890_v2 = vadd.s32 4294967224, %v881_v55  ;;  %v893_v6 = vadd.s32 4294967288, %v881_v55  ;;  %v896_v7 = vadd.s32 4294967272, %v881_v55 }
  0xfb   :  { %v903_v15 = vadd.s32 4294967232, %v881_v55  ;;  %v906_v17 = vadd.s32 4294967208, %v881_v55  ;;  %v459_v23 = vsub.s32 %v881_v55, %v887_v1  ;;  %v468_v31 = vadd.s32 4294967280, %v881_v55  ;;  %p736_p13 = por %p735_p12, %p734_p11 }
  0xfc   :  { %325 = vadd.xlane.f32.xlu1 %v324_v20  ;;  %v520_v14 = vsub.s32 %v890_v2, %v887_v1  ;;  %v478_v22 = vsub.s32 %v896_v7, %v887_v1 }
  0xfd   :  { %322 = vadd.xlane.f32.xlu0 %v321_v21  ;;  %v464_v21 = vsub.s32 %v893_v6, %v887_v1  ;;  %p737_p0 = pnand %p736_p13, %p730_p10 }
 0x100   :  { %331 = vadd.xlane.f32.xlu1 %v330_v28 }
 0x101   :  { %328 = vadd.xlane.f32.xlu0 %v327_v30 }
 0x104   :  { %349 = vadd.xlane.f32.xlu1 %v348_v18  ;;  %v534_v18 = vsub.s32 %v906_v17, %v887_v1 }
 0x105   :  { %346 = vadd.xlane.f32.xlu0 %v345_v32  ;;  %v513_v32 = vsub.s32 %v903_v15, %v887_v1 }
 0x108   :  { %355 = vadd.xlane.f32.xlu1 %v354_v35 }
 0x109   :  { %352 = vadd.xlane.f32.xlu0 %v351_v36  ;;  %v922_v36 = vadd.s32 4294967216, %v881_v55 }
 0x175   :  { %v338_v38 = vpop.xlane.xlu1 %337 }
 0x176   :  { %v314_v39 = vpop.xlane.xlu0 %313  ;;  %v368_v49 = vadd.f32 %v873_v37, %v338_v38  ;;  %v925_v38 = vadd.s32 4294967256, %v881_v55 }
 0x177   :  { %v360_v40 = vadd.f32 %v873_v37, %v314_v39  ;;  %v482_v39 = vadd.s32 4294967264, %v881_v55 }
 0x178   :  { %v384_v56 = vmul.f32 0.5, %v368_v49 }
 0x179   :  { %v320_v41 = vpop.xlane.xlu1 %319  ;;  %v376_v29 = vmul.f32 0.5, %v360_v40 }
 0x17a   :  { %v311_v42 = vpop.xlane.xlu0 %310  ;;  %v362_v44 = vadd.f32 %v873_v37, %v320_v41 }
 0x17b   :  { %v359_v43 = vadd.f32 %v873_v37, %v311_v42  ;;  %657 = vtanh.f32 %v376_v29 }
 0x17c   :  { %v378_v50 = vmul.f32 0.5, %v362_v44 }
 0x17d   :  { %v375_v45 = vmul.f32 0.5, %v359_v43  ;;  %v344_v46 = vpop.xlane.xlu1 %343 }
 0x17e   :  { %v335_v47 = vpop.xlane.xlu0 %334  ;;  %v370_v57 = vadd.f32 %v873_v37, %v344_v46  ;;  %v471_v46 = vsub.s32 %v468_v31, %v887_v1 }
 0x17f   :  { %659 = vtanh.f32 %v375_v45  ;;  %v367_v51 = vadd.f32 %v873_v37, %v335_v47  ;;  %v503_v47 = vadd.s32 4294967240, %v881_v55 }
 0x180   :  { %661 = vtanh.f32 %v378_v50  ;;  %v386_v3 = vmul.f32 0.5, %v370_v57 }
 0x181   :  { %v317_v52 = vpop.xlane.xlu1 %316  ;;  %v383_v59 = vmul.f32 0.5, %v367_v51 }
 0x182   :  { %v341_v53 = vpop.xlane.xlu0 %340  ;;  %v361_v54 = vadd.f32 %v873_v37, %v317_v52 }
 0x183   :  { %v369_v60 = vadd.f32 %v873_v37, %v341_v53  ;;  %v527_v53 = vsub.s32 %v922_v36, %v887_v1 }
 0x184   :  { %v377_v58 = vmul.f32 0.5, %v361_v54  ;;  %v492_v54 = vsub.s32 %v925_v38, %v887_v1 }
 0x185   :  { %v326_v61 = vpop.xlane.xlu1 %325  ;;  %v385_v8 = vmul.f32 0.5, %v369_v60 }
 0x186   :  { %v323_v62 = vpop.xlane.xlu0 %322  ;;  %663 = vtanh.f32 %v377_v58  ;;  %v364_v63 = vadd.f32 %v873_v37, %v326_v61  ;;  %v506_v61 = vsub.s32 %v503_v47, %v887_v1 }
 0x187   :  { %v363_v0 = vadd.f32 %v873_v37, %v323_v62  ;;  %665 = vtanh.f32 %v384_v56  ;;  %v940_v62 = vadd.s32 4294967192, %v881_v55 }
 0x188   :  { %v380_v4 = vmul.f32 0.5, %v364_v63  ;;  %667 = vtanh.f32 %v383_v59  ;;  %v658_v13 = vpop.eup %657  ;;  %v485_v59 = vsub.s32 %v482_v39, %v887_v1 }
 0x189   :  { %v379_v5 = vmul.f32 0.5, %v363_v0  ;;  %v332_v9 = vpop.xlane.xlu1 %331  ;;  %v408_v30 = vmul.f32 0.5, %v658_v13 }
 0x18a   :  { %v329_v10 = vpop.xlane.xlu0 %328  ;;  %669 = vtanh.f32 %v380_v4  ;;  %v366_v11 = vadd.f32 %v873_v37, %v332_v9 }
 0x18b   :  { %v365_v12 = vadd.f32 %v873_v37, %v329_v10  ;;  %671 = vtanh.f32 %v379_v5  ;;  %v424_v45 = vadd.f32 0.5, %v408_v30 }
 0x18c   :  { %v660_v16 = vpop.eup %659  ;;  %673 = vtanh.f32 %v386_v3  ;;  %v382_v19 = vmul.f32 0.5, %v366_v11 }
 0x18d   :  { %v381_v20 = vmul.f32 0.5, %v365_v12  ;;  %675 = vtanh.f32 %v385_v8  ;;  %v350_v24 = vpop.xlane.xlu1 %349  ;;  %v407_v26 = vmul.f32 0.5, %v660_v16  ;;  %v662_v35 = vpop.eup %661  ;;  %v465_v0 = vrot.slane %v424_v45, %v464_v21 }
 0x18e   :  { %v347_v25 = vpop.xlane.xlu0 %346  ;;  %677 = vtanh.f32 %v382_v19  ;;  %v372_v27 = vadd.f32 %v873_v37, %v350_v24  ;;  %v410_v48 = vmul.f32 0.5, %v662_v35  ;;  %v538_v21 = vadd.s32 4294967200, %v881_v55 }
 0x18f   :  { %v371_v28 = vadd.f32 %v873_v37, %v347_v25  ;;  %679 = vtanh.f32 %v381_v20  ;;  %v423_v42 = vadd.f32 0.5, %v407_v26 }
 0x190   :  { %v388_v33 = vmul.f32 0.5, %v372_v27  ;;  %v426_v3 = vadd.f32 0.5, %v410_v48  ;;  %v548_v27 = vsub.s32 %v940_v62, %v887_v1 }
 0x191   :  { %v387_v34 = vmul.f32 0.5, %v371_v28  ;;  %v356_v40 = vpop.xlane.xlu1 %355  ;;  %v460_v57 = vrot.slane %v423_v42, %v459_v23 }
 0x192   :  { %v353_v41 = vpop.xlane.xlu0 %352  ;;  %681 = vtanh.f32 %v388_v33  ;;  %v374_v29 = vadd.f32 %v873_v37, %v356_v40  ;;  %v479_v25 = vrot.slane %v426_v3, %v478_v22  ;;  %v552_v33 = vadd.s32 4294967184, %v881_v55 }
 0x193   :  { %v373_v43 = vadd.f32 %v873_v37, %v353_v41  ;;  %v664_v44 = vpop.eup %663  ;;  %683 = vtanh.f32 %v387_v34  ;;  %v496_v37 = vadd.s32 4294967248, %v881_v55  ;;  %v467_v11 = vsel %vm466_vm2, %v465_v0, %v460_v57 }
 0x194   :  { %v409_v49 = vmul.f32 0.5, %v664_v44  ;;  %v390_v50 = vmul.f32 0.5, %v374_v29  ;;  %v666_v52 = vpop.eup %665  ;;  %v559_v22 = vadd.s32 4294967176, %v881_v55 }
 0x195   :  { %v389_v51 = vmul.f32 0.5, %v373_v43  ;;  %v668_v56 = vpop.eup %667  ;;  %v499_v9 = vsub.s32 %v496_v37, %v887_v1  ;;  %v416_v24 = vmul.f32 0.5, %v666_v52  ;;  %v555_v52 = vsub.s32 %v552_v33, %v887_v1 }
 0x196   :  { %v425_v58 = vadd.f32 0.5, %v409_v49  ;;  %685 = vtanh.f32 %v390_v50  ;;  %v415_v16 = vmul.f32 0.5, %v668_v56  ;;  %v562_v57 = vsub.s32 %v559_v22, %v887_v1 }
 0x197   :  { %v670_v60 = vpop.eup %669  ;;  %687 = vtanh.f32 %v389_v51  ;;  %v432_v43 = vadd.f32 0.5, %v416_v24 }
 0x198   :  { %v672_v63 = vpop.eup %671  ;;  %v472_v4 = vrot.slane %v425_v58, %v471_v46  ;;  %v412_v5 = vmul.f32 0.5, %v670_v60  ;;  %v431_v41 = vadd.f32 0.5, %v415_v16  ;;  %v541_v46 = vsub.s32 %v538_v21, %v887_v1 }
 0x199   :  { %v674_v6 = vpop.eup %673  ;;  %v411_v8 = vmul.f32 0.5, %v672_v63 }
 0x19a   :  { %v676_v10 = vpop.eup %675  ;;  %v428_v12 = vadd.f32 0.5, %v412_v5  ;;  %v474_v19 = vsel %vm473_vm3, %v472_v4, %v467_v11  ;;  %v418_v34 = vmul.f32 0.5, %v674_v6  ;;  %v514_v55 = vrot.slane %v431_v41, %v513_v32 }
 0x19b   :  { %v678_v13 = vpop.eup %677  ;;  %v427_v20 = vadd.f32 0.5, %v411_v8  ;;  %v417_v28 = vmul.f32 0.5, %v676_v10  ;;  %v481_v38 = vsel %vm480_vm4, %v479_v25, %v474_v19 }
 0x19c   :  { %v680_v23 = vpop.eup %679  ;;  %v414_v26 = vmul.f32 0.5, %v678_v13  ;;  %v493_v35 = vrot.slane %v428_v12, %v492_v54  ;;  %v434_v50 = vadd.f32 0.5, %v418_v34 }
 0x19d   :  { %v486_v30 = vrot.slane %v427_v20, %v485_v59  ;;  %v413_v31 = vmul.f32 0.5, %v680_v23  ;;  %v433_v47 = vadd.f32 0.5, %v417_v28  ;;  %v521_v59 = vrot.slane %v432_v43, %v520_v14 }
 0x19e   :  { %v430_v39 = vadd.f32 0.5, %v414_v26  ;;  %v535_v0 = vrot.slane %v434_v50, %v534_v18 }
 0x19f   :  { %v682_v40 = vpop.eup %681  ;;  %v488_v42 = vsel %vm487_vm5, %v486_v30, %v481_v38  ;;  %v429_v7 = vadd.f32 0.5, %v413_v31  ;;  %v528_v63 = vrot.slane %v433_v47, %v527_v53 }
 0x1a0   :  { %v684_v29 = vpop.eup %683  ;;  %v507_v44 = vrot.slane %v430_v39, %v506_v61  ;;  %v420_v45 = vmul.f32 0.5, %v682_v40  ;;  %v495_v51 = vsel %vm494_vm6, %v493_v35, %v488_v42 }
 0x1a1   :  { %v500_v48 = vrot.slane %v429_v7, %v499_v9  ;;  %v419_v49 = vmul.f32 0.5, %v684_v29 }
 0x1a2   :  { %v436_v61 = vadd.f32 0.5, %v420_v45 }
 0x1a3   :  { %v686_v54 = vpop.eup %685  ;;  %v502_v37 = vsel %vm501_vm7, %v500_v48, %v495_v51  ;;  %v435_v56 = vadd.f32 0.5, %v419_v49 }
 0x1a4   :  { %v688_v58 = vpop.eup %687  ;;  %v509_v60 = vsel %vm508_vm8, %v507_v44, %v502_v37  ;;  %v422_v62 = vmul.f32 0.5, %v686_v54  ;;  %v549_v6 = vrot.slane %v436_v61, %v548_v27 }
 0x1a5   :  { %v516_v15 = vsel %vm515_vm9, %v514_v55, %v509_v60  ;;  %v421_v32 = vmul.f32 0.5, %v688_v58  ;;  %v542_v14 = vrot.slane %v435_v56, %v541_v46 }
 0x1a6   :  { %v438_v3 = vadd.f32 0.5, %v422_v62  ;;  %v523_v2 = vsel %vm522_vm10, %v521_v59, %v516_v15 }
 0x1a7   :  { %v437_v4 = vadd.f32 0.5, %v421_v32  ;;  %v530_v5 = vsel %vm529_vm11, %v528_v63, %v523_v2 }
 0x1a8   :  { %v537_v36 = vsel %vm536_vm12, %v535_v0, %v530_v5  ;;  %v563_v53 = vrot.slane %v438_v3, %v562_v57 }
 0x1a9   :  { %v556_v8 = vrot.slane %v437_v4, %v555_v52  ;;  %v544_v9 = vsel %vm543_vm13, %v542_v14, %v537_v36 }
 0x1aa   :  { %v551_v1 = vsel %vm550_vm14, %v549_v6, %v544_v9 }
 0x1ab   :  { %v558_v17 = vsel %vm557_vm15, %v556_v8, %v551_v1 }
 0x1ac   :  { %v565_v18 = vsel %vm564_vm0, %v563_v53, %v558_v17 }
 0x1ad   :  { %567 = vst [vmem:[#allocation8] sm:$0x1] %v565_v18 }
 0x1ae   :  { %740 = shalt.err (!%p737_p0)
}
 0x1af   :  { %577 = dma.vmem_to_hbm [thread:$0]  %s575_s8, 16, %s984_s5, [#allocation5]  }
 0x1b0   :  { %753 = dma.done.wait [#allocation5], 16  }
 0x1b1   :  { %754 = vsyncadd [#allocation5], 4294967280 }
 0x1b2   :  { %581 = vsyncpa [#allocation4], 1 }
 0x1b3   :  { %582 = vsyncpa [#allocation7], 1 }
 0x1b4   :  { %583 = vsyncpa [#allocation5], 1 }

</bundles_post_ra>
